<compile_context>
chip_gen: v5e
topology: v5e:2x2
jax: 0.10.0
libtpu: 0.0.40
codegen_flags: <defaults>
</compile_context>

<pallas_src>
import functools

import jax
import jax.numpy as jnp
from jax import lax
from jax.experimental import pallas as pl
from jax.experimental.pallas import tpu as pltpu


def _round_up(x, m):
    return (x + m - 1) // m * m


def _portfolio_kernel(w_ref, e_ref, r_ref, out_ref, m_sc, la_sc, *,
                      n_valid, block_n):
    """One stock tile of the online-softmax portfolio reduction.

    w_ref  : (M, F)   portfolio weights (VMEM-resident, stream dtype)
    e_ref  : (TN, F)  stock latent features for this tile (stream dtype)
    r_ref  : (2, TN)  f32 fused RHS: row 0 = ones (denominator), row 1 = y
    out_ref: (M, 1)   f32 portfolio returns (written on the last tile)
    m_sc   : (M, 1)   f32 running row max
    la_sc  : (M, 2)   f32 running [denominator, numerator]
    """
    n_idx = pl.program_id(0)

    @pl.when(n_idx == 0)
    def _():
        m_sc[...] = jnp.full_like(m_sc, -jnp.inf)
        la_sc[...] = jnp.zeros_like(la_sc)

    # Logits for this stock tile: (M, TN) = w_p @ e_blk.T.
    # Contract the feature axis of both operands (A @ B^T is a native MXU
    # feed; no explicit transpose of e).  b_p is omitted: softmax over the
    # stock axis is shift-invariant per portfolio, so the bias is a no-op.
    logits = lax.dot_general(
        w_ref[...], e_ref[...],
        dimension_numbers=(((1,), (1,)), ((), ())),
        preferred_element_type=jnp.float32)

    # Mask padded stocks.  Only emitted when the wrapper actually padded N.
    # The padded lanes also carry zeros in both RHS rows, so this mask only
    # guards the running max / exp range; its VPU cost is hidden under the
    # HBM-bound tile DMA.
    if n_valid % block_n != 0:
        lane = lax.broadcasted_iota(jnp.int32, logits.shape, 1)
        valid = (n_idx * block_n + lane) < n_valid
        logits = jnp.where(valid, logits, -1e30)

    # Online softmax over the stock axis (lanes).
    m_blk = jnp.max(logits, axis=-1, keepdims=True)              # (M, 1)
    m_new = jnp.maximum(m_sc[...], m_blk)
    scale = jnp.exp(m_sc[...] - m_new)                           # (M, 1)
    p = jnp.exp(logits - m_new)                                  # (M, TN) f32

    # Fused denominator + numerator: one MXU dot against [ones; y] -> (M, 2).
    # p and the RHS are f32, so the running stats keep full f32 precision.
    stats = lax.dot_general(
        p, r_ref[...],
        dimension_numbers=(((1,), (1,)), ((), ())),
        preferred_element_type=jnp.float32)

    la_sc[...] = scale * la_sc[...] + stats
    m_sc[...] = m_new

    @pl.when(n_idx == pl.num_programs(0) - 1)
    def _():
        la = la_sc[...]
        out_ref[...] = la[:, 1:2] / la[:, 0:1]


def _choose_block_n(feat, itemsize, target_block_bytes, max_stream_vmem_bytes):
    """Largest lane-aligned stock tile meeting the HBM-traffic target while the
    double-buffered, lane-padded stream footprint stays within budget."""
    f_lanes = _round_up(max(feat, 1), 128)
    # Per-stock VMEM of the streamed operands (double-buffered):
    #   e tile row      -> f_lanes lanes x itemsize   (lane-padded when F < 128)
    #   [ones; y] column-> 8 sublanes x 4 bytes
    per_stock = 2 * (f_lanes * itemsize + 8 * 4)
    tn_vmem_cap = max(max_stream_vmem_bytes // per_stock, 128)
    tn_target = max(target_block_bytes // max(feat * itemsize, 1), 128)
    tn = min(tn_target, tn_vmem_cap)
    return _round_up(tn, 128)


def _vmem_limit_bytes(num_p, feat, tn, itemsize):
    """Lane/sublane-padded VMEM footprint of the pipelined kernel + headroom."""
    f_lanes = _round_up(feat, 128)
    e_bytes = 2 * _round_up(tn, 16) * f_lanes * itemsize          # e stream (x2 buffers)
    r_bytes = 2 * 8 * _round_up(tn, 128) * 4                      # [ones; y] stream
    w_bytes = 2 * _round_up(num_p, 16) * f_lanes * itemsize       # resident weights
    o_bytes = 2 * _round_up(num_p, 8) * 128 * 4                   # output block
    s_bytes = 2 * _round_up(num_p, 8) * 128 * 4                   # m / [l, acc] scratch
    total = e_bytes + r_bytes + w_bytes + o_bytes + s_bytes + (4 << 20)
    return max(int(total), 16 * 1024 * 1024)


def portfolio_forward(y, e, w_p, b_p=None, *, stream_dtype=jnp.bfloat16,
                      block_n=None, target_block_bytes=2 << 20,
                      max_stream_vmem_bytes=20 << 20):
    """Pallas forward of PortfolioLayer.

    y: (N,) or (N, 1) stock returns; e: (N, F) stock latent features;
    w_p: (M, F); b_p: (M, 1) (accepted for API parity; being a per-portfolio
    constant along the softmax axis it has no effect on the output).
    Returns (M,) if y is 1-D else (M, 1).
    """
    del b_p  # softmax(dim=-1) is shift-invariant per row -> the bias is a no-op.

    squeeze_out = (y.ndim == 1)
    y_flat = y.reshape(-1).astype(jnp.float32)
    N, F = e.shape
    M = w_p.shape[0]

    # Only the large streamed operand (e) and the resident weights go through
    # the MXU in the stream dtype; softmax math / accumulators stay f32.
    e_s = e.astype(stream_dtype)
    w_s = w_p.astype(stream_dtype)
    itemsize = jnp.dtype(stream_dtype).itemsize

    # Stock tile: one block if N fits, else ~target_block_bytes of e per step.
    if block_n is None:
        tn_cap = _choose_block_n(F, itemsize, target_block_bytes,
                                 max_stream_vmem_bytes)
    else:
        tn_cap = _round_up(block_n, 128)
    n_single = _round_up(N, 8)
    if n_single <= tn_cap:
        tn = n_pad = n_single
    else:
        tn = tn_cap
        n_pad = _round_up(N, tn)

    if n_pad != N:
        e_s = jnp.pad(e_s, ((0, n_pad - N), (0, 0)))
        y_flat = jnp.pad(y_flat, (0, n_pad - N))

    # Fused softmax-stats RHS (f32, tiny HBM traffic): row 0 counts valid
    # stocks (denominator), row 1 is y (numerator); padded lanes are zero.
    ones = (jnp.arange(n_pad) < N).astype(jnp.float32)
    rhs = jnp.stack([ones, y_flat], axis=0)          # (2, n_pad), lane-dense

    grid = (n_pad // tn,)
    kernel = functools.partial(_portfolio_kernel, n_valid=N, block_n=tn)

    out = pl.pallas_call(
        kernel,
        out_shape=jax.ShapeDtypeStruct((M, 1), jnp.float32),
        grid=grid,
        in_specs=[
            pl.BlockSpec((M, F), lambda n: (0, 0)),    # w_p   (VMEM-resident)
            # e stream; if a trace ever shows exposed DMA at the pipeline head,
            # sweep pipeline_mode=pl.Buffered(3) here.
            pl.BlockSpec((tn, F), lambda n: (n, 0)),   # e     (streamed over stocks)
            pl.BlockSpec((2, tn), lambda n: (0, n)),   # [ones; y] (streamed)
        ],
        out_specs=pl.BlockSpec((M, 1), lambda n: (0, 0)),
        scratch_shapes=[
            pltpu.VMEM((M, 1), jnp.float32),           # running max
            pltpu.VMEM((M, 2), jnp.float32),           # running [denom, numer]
        ],
        compiler_params=pltpu.CompilerParams(
            dimension_semantics=("arbitrary",),        # softmax reduction axis
            vmem_limit_bytes=_vmem_limit_bytes(M, F, tn, itemsize),
        ),
    )(w_s, e_s, rhs)

    return out[:, 0] if squeeze_out else out


def _reference(y, e, w_p, b_p):
    """Pure-JAX reference mirroring the PyTorch forward, with the matmuls
    pinned to highest precision so the comparison is unambiguous."""
    logits = jnp.matmul(w_p, e.T, precision=lax.Precision.HIGHEST) + b_p
    a_p = jax.nn.softmax(logits, axis=-1)
    return jnp.matmul(a_p, y, precision=lax.Precision.HIGHEST)


def _bf16_round(x):
    # Test inputs are pre-rounded to bf16 so the bf16 and f32 kernel paths see
    # identical operand values; the kernel-vs-reference comparison then does
    # not depend on any backend-internal matmul operand rounding.
    return x.astype(jnp.bfloat16).astype(jnp.float32)


if __name__ == "__main__":
    key = jax.random.PRNGKey(0)
    k1, k2, k3, k4, k5, k6, k7, k8 = jax.random.split(key, 8)

    # Tolerance sized for the worst case where the probability block is rounded
    # to bf16 inside the fused stats matmul; typical agreement is ~1e-6.
    TOL = dict(rtol=1e-2, atol=1e-2)

    # --- Small shapes: M=8 portfolios, N=16 stocks, F=32 features (f32 path).
    M, N, F = 8, 16, 32
    w_p = _bf16_round(jax.random.normal(k1, (M, F), jnp.float32))
    b_p = jax.random.normal(k2, (M, 1), jnp.float32)
    e = _bf16_round(jax.random.normal(k3, (N, F), jnp.float32))
    y = _bf16_round(jax.random.normal(k4, (N,), jnp.float32))

    out = jax.block_until_ready(
        portfolio_forward(y, e, w_p, b_p, stream_dtype=jnp.float32))
    ref = _reference(y, e, w_p, b_p)
    assert out.shape == (M,)
    assert jnp.allclose(out, ref, **TOL), (out, ref)

    # Same inputs with y as a column vector -> (M, 1), like torch.matmul.
    out_col = jax.block_until_ready(
        portfolio_forward(y[:, None], e, w_p, b_p, stream_dtype=jnp.float32))
    assert out_col.shape == (M, 1)
    assert jnp.allclose(out_col[:, 0], ref, **TOL)

    # --- Larger, non-aligned N: multi-tile online softmax + padding mask (f32).
    M2, N2, F2 = 16, 300, 64
    w2 = _bf16_round(jax.random.normal(k5, (M2, F2), jnp.float32))
    b2 = jax.random.normal(k6, (M2, 1), jnp.float32)
    e2 = _bf16_round(jax.random.normal(k7, (N2, F2), jnp.float32))
    y2 = _bf16_round(jax.random.normal(k8, (N2,), jnp.float32))

    out2 = jax.block_until_ready(
        portfolio_forward(y2, e2, w2, b2, stream_dtype=jnp.float32, block_n=128))
    ref2 = _reference(y2, e2, w2, b2)
    assert out2.shape == (M2,)
    assert jnp.allclose(out2, ref2, **TOL), (out2, ref2)

    # --- Default perf path: bf16-streamed e / w_p, f32 softmax + accumulation.
    out3 = jax.block_until_ready(portfolio_forward(y2, e2, w2, b2))
    assert out3.shape == (M2,)
    assert jnp.allclose(out3, ref2, **TOL), (out3, ref2)

    # bf16 path with forced multi-tile streaming (exercises mask + online merge).
    out4 = jax.block_until_ready(portfolio_forward(y2, e2, w2, b2, block_n=128))
    assert jnp.allclose(out4, ref2, **TOL), (out4, ref2)

    print("KERNEL_OK")
</pallas_src>

<mosaic_0001>
module attributes {stable_mosaic.version = 11 : i64} {
  func.func @_portfolio_kernel(%arg0: i32, %arg1: memref<8x32xf32, #tpu.memory_space<vmem>>, %arg2: memref<16x32xf32, #tpu.memory_space<vmem>>, %arg3: memref<2x16xf32, #tpu.memory_space<vmem>>, %arg4: memref<8x1xf32, #tpu.memory_space<vmem>>, %arg5: memref<8x1xf32, #tpu.memory_space<vmem>>, %arg6: memref<8x2xf32, #tpu.memory_space<vmem>>) attributes {dimension_semantics = [#tpu.dimension_semantics<arbitrary>], iteration_bounds = array<i64: 1>, scalar_prefetch = 0 : i64, scratch_operands = 2 : i64, tpu.core_type = #tpu.core_type<tc>, window_params = [{pipeline_mode = #tpu.pipeline_mode<synchronous>, transform_indices = @transform_0, window_bounds = array<i64: 8, 32>}, {transform_indices = @transform_1, window_bounds = array<i64: 16, 32>}, {transform_indices = @transform_2, window_bounds = array<i64: 2, 16>}, {pipeline_mode = #tpu.pipeline_mode<synchronous>, transform_indices = @transform_3, window_bounds = array<i64: 8, 1>}]} {
    %c0_i32 = arith.constant 0 : i32
    %0 = arith.cmpi eq, %arg0, %c0_i32 : i32
    %1 = arith.extui %0 : i1 to i32
    %c0_i32_0 = arith.constant 0 : i32
    %2 = arith.cmpi ne, %1, %c0_i32_0 : i32
    scf.if %2 {
      %cst_20 = arith.constant 0xFF800000 : f32
      %27 = vector.broadcast %cst_20 : f32 to vector<8x1xf32>
      %c0_21 = arith.constant 0 : index
      %c0_22 = arith.constant 0 : index
      %28 = vector.load %arg5[%c0_21, %c0_22] : memref<8x1xf32, #tpu.memory_space<vmem>>, vector<8x1xf32>
      tpu.vector_store %arg5[%c0_21, %c0_22], %27 {strides = array<i32>} : memref<8x1xf32, #tpu.memory_space<vmem>>, vector<8x1xf32>,
      %cst_23 = arith.constant 0.000000e+00 : f32
      %29 = vector.broadcast %cst_23 : f32 to vector<8x2xf32>
      %c0_24 = arith.constant 0 : index
      %c0_25 = arith.constant 0 : index
      %30 = vector.load %arg6[%c0_24, %c0_25] : memref<8x2xf32, #tpu.memory_space<vmem>>, vector<8x2xf32>
      tpu.vector_store %arg6[%c0_24, %c0_25], %29 {strides = array<i32>} : memref<8x2xf32, #tpu.memory_space<vmem>>, vector<8x2xf32>,
    } else {
    }
    %c0 = arith.constant 0 : index
    %c0_1 = arith.constant 0 : index
    %3 = vector.load %arg1[%c0, %c0_1] : memref<8x32xf32, #tpu.memory_space<vmem>>, vector<8x32xf32>
    %c0_2 = arith.constant 0 : index
    %c0_3 = arith.constant 0 : index
    %4 = vector.load %arg2[%c0_2, %c0_3] : memref<16x32xf32, #tpu.memory_space<vmem>>, vector<16x32xf32>
    %cst = arith.constant dense<0.000000e+00> : vector<8x16xf32>
    %5 = tpu.matmul %3, %4, %cst {dimension_numbers = #tpu.dot_dimension_numbers<[1], [1], [0], [0], [0, 0, 1, 0], [], []>} : vector<8x32xf32>, vector<16x32xf32>, vector<8x16xf32> -> vector<8x16xf32>
    %cst_4 = arith.constant dense<0xFF800000> : vector<8xf32>
    %6 = vector.multi_reduction <maximumf>, %5, %cst_4 [1] : vector<8x16xf32> to vector<8xf32>
    %7 = vector.shape_cast %6 : vector<8xf32> to vector<8x1xf32>
    %c0_5 = arith.constant 0 : index
    %c0_6 = arith.constant 0 : index
    %8 = vector.load %arg5[%c0_5, %c0_6] : memref<8x1xf32, #tpu.memory_space<vmem>>, vector<8x1xf32>
    %9 = arith.maximumf %8, %7 : vector<8x1xf32>
    %c0_7 = arith.constant 0 : index
    %c0_8 = arith.constant 0 : index
    %10 = vector.load %arg5[%c0_7, %c0_8] : memref<8x1xf32, #tpu.memory_space<vmem>>, vector<8x1xf32>
    %11 = arith.subf %10, %9 : vector<8x1xf32>
    %12 = math.exp %11 : vector<8x1xf32>
    %13 = vector.broadcast %9 : vector<8x1xf32> to vector<8x16xf32>
    %14 = arith.subf %5, %13 : vector<8x16xf32>
    %15 = math.exp %14 : vector<8x16xf32>
    %c0_9 = arith.constant 0 : index
    %c0_10 = arith.constant 0 : index
    %16 = vector.load %arg3[%c0_9, %c0_10] : memref<2x16xf32, #tpu.memory_space<vmem>>, vector<2x16xf32>
    %cst_11 = arith.constant dense<0.000000e+00> : vector<8x2xf32>
    %17 = tpu.matmul %15, %16, %cst_11 {dimension_numbers = #tpu.dot_dimension_numbers<[1], [1], [0], [0], [0, 0, 1, 0], [], []>} : vector<8x16xf32>, vector<2x16xf32>, vector<8x2xf32> -> vector<8x2xf32>
    %c0_12 = arith.constant 0 : index
    %c0_13 = arith.constant 0 : index
    %18 = vector.load %arg6[%c0_12, %c0_13] : memref<8x2xf32, #tpu.memory_space<vmem>>, vector<8x2xf32>
    %19 = vector.broadcast %12 : vector<8x1xf32> to vector<8x2xf32>
    %20 = arith.mulf %19, %18 : vector<8x2xf32>
    %21 = arith.addf %20, %17 : vector<8x2xf32>
    %c0_14 = arith.constant 0 : index
    %c0_15 = arith.constant 0 : index
    %22 = vector.load %arg6[%c0_14, %c0_15] : memref<8x2xf32, #tpu.memory_space<vmem>>, vector<8x2xf32>
    tpu.vector_store %arg6[%c0_14, %c0_15], %21 {strides = array<i32>} : memref<8x2xf32, #tpu.memory_space<vmem>>, vector<8x2xf32>,
    %c0_16 = arith.constant 0 : index
    %c0_17 = arith.constant 0 : index
    %23 = vector.load %arg5[%c0_16, %c0_17] : memref<8x1xf32, #tpu.memory_space<vmem>>, vector<8x1xf32>
    tpu.vector_store %arg5[%c0_16, %c0_17], %9 {strides = array<i32>} : memref<8x1xf32, #tpu.memory_space<vmem>>, vector<8x1xf32>,
    %c0_i32_18 = arith.constant 0 : i32
    %24 = arith.cmpi eq, %arg0, %c0_i32_18 : i32
    %25 = arith.extui %24 : i1 to i32
    %c0_i32_19 = arith.constant 0 : i32
    %26 = arith.cmpi ne, %25, %c0_i32_19 : i32
    scf.if %26 {
      %c0_20 = arith.constant 0 : index
      %c0_21 = arith.constant 0 : index
      %27 = vector.load %arg6[%c0_20, %c0_21] : memref<8x2xf32, #tpu.memory_space<vmem>>, vector<8x2xf32>
      %28 = vector.extract_strided_slice %27 {offsets = [0, 1], sizes = [8, 1], strides = [1, 1]} : vector<8x2xf32> to vector<8x1xf32>
      %29 = vector.extract_strided_slice %27 {offsets = [0, 0], sizes = [8, 1], strides = [1, 1]} : vector<8x2xf32> to vector<8x1xf32>
      %30 = arith.divf %28, %29 : vector<8x1xf32>
      %c0_22 = arith.constant 0 : index
      %c0_23 = arith.constant 0 : index
      %31 = vector.load %arg4[%c0_22, %c0_23] : memref<8x1xf32, #tpu.memory_space<vmem>>, vector<8x1xf32>
      tpu.vector_store %arg4[%c0_22, %c0_23], %30 {strides = array<i32>} : memref<8x1xf32, #tpu.memory_space<vmem>>, vector<8x1xf32>,
    } else {
    }
    return
  }
  func.func @transform_0(%arg0: i32) -> (i32, i32) {
    %c0_i32 = arith.constant 0 : i32
    %c0_i32_0 = arith.constant 0 : i32
    %c0_i32_1 = arith.constant 0 : i32
    return %c0_i32, %c0_i32_0 : i32, i32
  }
  func.func @transform_1(%arg0: i32) -> (i32, i32) {
    %c0_i32 = arith.constant 0 : i32
    %c0_i32_0 = arith.constant 0 : i32
    return %arg0, %c0_i32 : i32, i32
  }
  func.func @transform_2(%arg0: i32) -> (i32, i32) {
    %c0_i32 = arith.constant 0 : i32
    %c0_i32_0 = arith.constant 0 : i32
    return %c0_i32, %arg0 : i32, i32
  }
  func.func @transform_3(%arg0: i32) -> (i32, i32) {
    %c0_i32 = arith.constant 0 : i32
    %c0_i32_0 = arith.constant 0 : i32
    %c0_i32_1 = arith.constant 0 : i32
    return %c0_i32, %c0_i32_0 : i32, i32
  }
}

</mosaic_0001>

<bundles_post_ra>
// kernel: tpu_custom_call.1
= control target key start
LH: loop header
LB: loop body
LE: loop exit
PB: predicated region body
PF: predicated region fallthrough
CT: control target
= control target key end

     0   :  { %8 = vsyncpa [#allocation5], 0  ;;  %s337_s0 = inlined_call_operand.hbm [shape: f32[8,32], index: 0, kind: input, shape index: {}]   ;;  %s338_s1 = inlined_call_operand.hbm [shape: f32[16,32], index: 1, kind: input, shape index: {}]   ;;  %s339_s2 = inlined_call_operand.hbm [shape: f32[2,16], index: 2, kind: input, shape index: {}]   ;;  %s340_s3 = inlined_call_operand.vmem [shape: f32[8,1], index: 3, kind: output, shape index: {}]  }
   0x1   :  { %9 = vsyncpa [#allocation7], 0  ;;  %s25_s14 = sshll.u32 %s338_s1, 4  ;;  %s287_s15 = smov [#allocation6]   ;;  %s26_s14 = int_to_ptr.hbm [resolvable:$true] %s25_s14 }
   0x2   :  { %s27_s16 = sshll.u32 %s287_s15, 4  ;;  %s15_s19 = sshll.u32 %s337_s0, 4  ;;  %s28_s16 = int_to_ptr.vmem [resolvable:$true] %s27_s16  ;;  %s16_s19 = int_to_ptr.hbm [resolvable:$true] %s15_s19 }
   0x3   :  { %s288_s20 = smov 128   ;;  %s289_s21 = smov 8  }
   0x4   :  { %33 = dma.hbm_to_vmem [thread:$0]  %s26_s14, 256, %s28_s16, [#allocation7], %s288_s20, %s288_s20, %s289_s21  }
   0x5   :  { %s290_s22 = smov [#allocation4]   ;;  %s39_s26 = sshll.u32 %s339_s2, 4  ;;  %s40_s26 = int_to_ptr.hbm [resolvable:$true] %s39_s26 }
   0x6   :  { %s17_s23 = sshll.u32 %s290_s22, 4  ;;  %s291_s1 = smov [#allocation8]   ;;  %s18_s23 = int_to_ptr.vmem [resolvable:$true] %s17_s23 }
   0x7   :  { %20 = dma.hbm_to_vmem [thread:$0]  %s16_s19, 128, %s18_s23, [#allocation5]  }
   0x8   :  { %s41_s27 = sshll.u32 %s291_s1, 4  ;;  %s42_s27 = int_to_ptr.vmem [resolvable:$true] %s41_s27 }
   0x9   :  { %44 = dma.hbm_to_vmem [thread:$0]  %s40_s26, 32, %s42_s27, [#allocation7]  }
   0xa   :  { %283 = dma.done.wait [#allocation5], 128  }
   0xb   :  { %284 = vsyncadd [#allocation5], 4294967168 }
   0xc   :  { %285 = dma.done.wait [#allocation7], 288  }
   0xd   :  { %286 = vsyncadd [#allocation7], 4294967008  ;;  %vm68_vm0 = vcmask 261120   ;;  %v67_v0 = vld [vmem:[#allocation6 + $0x8] sm:$0xff]  ;;  %v66_v1 = vld [vmem:[#allocation6] sm:$0xff]  ;;  %vm61_vm1 = vcmask 7168  }
   0xe   :  { %188 = vmatpush.xpose.msk.msra.mxu0 %vm68_vm0, %v67_v0  ;;  %v65_v2 = vld [vmem:[#allocation4] sm:$0xff]  ;;  %v292_v3 = vmov -inf   ;;  %vm98_vm2 = vcmask 130048   ;;  %v293_v6 = vmov 0   ;;  %vm63_vm3 = vcmask 15360   ;;  %s295_s0 = smov 1  }
   0xf   :  { %62 = vst.msk [vmem:[#allocation2] sm:$0xff] %vm61_vm1, %v292_v3  ;;  %203 = vset.pattern.permute.xlu0 %v293_v6  ;;  %204 = vset.pattern.permute.xlu1 %v293_v6  ;;  %v294_v13 = vmov 0.0   ;;  %v115_v14 = vld [vmem:[#allocation8] sm:$0x3]  ;;  %s296_s2 = smov 127  }
  0x10   :  { %64 = vst.msk [vmem:[#allocation3] sm:$0xff] %vm63_vm3, %v294_v13  ;;  %191 = vmatpush.xpose.msk.msra.mxu1 %vm98_vm2, %v115_v14 }
  0x12   :  { %189 = vmatpush.xpose.msk.msra.mxu0 %vm68_vm0, %v66_v1 }
  0x15   :  { %190 = vmatmul.msk.f32.vlgmr.msra.gmra.mxu0 %vm68_vm0, %v65_v2 }
  0x16   :  { %v102_v7 = vld [vmem:[#allocation2] sm:$0xff] }
  0x17   :  { %v142_v19 = vld [vmem:[#allocation3] sm:$0xff] }
  0x92   :  { %v95_v4 = vpop.f32.mrf.mxu0 }
  0x93   :  { %v99_v5 = vsel %vm98_vm2, %v95_v4, -inf }
  0x94   :  { %100 = vmax.xlane.f32.xlu0 %v99_v5 }
 0x107   :  { %v101_v8 = vpop.xlane.xlu0 %100 }
 0x108   :  { %v103_v9 = vmax.f32 %v102_v7, %v101_v8 }
 0x10a   :  { %v104_v10 = vsub.f32 %v102_v7, %v103_v9  ;;  %153 = vst.msk [vmem:[#allocation2] sm:$0xff] %vm61_vm1, %v103_v9  ;;  %109 = vperm.xlu0 %203, %v103_v9  }
 0x10c   :  { %v105_v11 = vmul.f32 1.442695, %v104_v10 }
 0x10e   :  { %205 = vpow2.f32 %v105_v11 }
 0x114   :  { %v206_v12 = vpop.eup %205 }
 0x115   :  { %145 = vperm.xlu1 %204, %v206_v12  }
 0x17c   :  { %v110_v15 = vpop.permute.xlu0 %109 }
 0x17d   :  { %v112_v16 = vsub.f32 %v95_v4, %v110_v15 }
 0x17f   :  { %v113_v17 = vmul.f32 1.442695, %v112_v16 }
 0x181   :  { %207 = vpow2.f32 %v113_v17 }
 0x187   :  { %v208_v18 = vpop.eup %207  ;;  %v146_v20 = vpop.permute.xlu1 %145 }
 0x188   :  { %192 = vmatmul.msk.f32.vlgmr.msra.gmra.mxu1 %vm98_vm2, %v208_v18  ;;  %v148_v21 = vmul.f32 %v146_v20, %v142_v19 }
 0x205   :  { %v139_v22 = vpop.f32.mrf.mxu1 }
 0x206   :  { %v149_v23 = vadd.f32 %v148_v21, %v139_v22 }
 0x208   :  { %151 = vst.msk [vmem:[#allocation3] sm:$0xff] %vm63_vm3, %v149_v23 }
 0x20f   :  { %v157_v24 = vld [vmem:[#allocation3] sm:$0xff] }
 0x210   :  { %159 = vrot.lane.b32.xlu1 %v157_v24, %s295_s0 }
 0x282   :  { %v160_v25 = vpop.permute.xlu1 %159 }
 0x283   :  { %209 = vrcp.f32 %v160_v25  ;;  %v173_v29 = vand.u32 2147483648, %v160_v25  ;;  %v171_v31 = vand.u32 2147483647, %v160_v25  ;;  %vm167_vm5 = vweird.f32 %v160_v25 }
 0x285   :  { %v174_v33 = vor.u32 1.1754944e-38, %v173_v29  ;;  %vm172_vm7 = vcmp.eq.f32.partialorder %v171_v31, 8.507059e+37 }
 0x289   :  { %v210_v26 = vpop.eup %209 }
 0x28a   :  { %v163_v27 = vmul.f32 %v210_v26, %v160_v25  ;;  %vm168_vm4 = vweird.f32 %v210_v26 }
 0x28b   :  { %vm169_vm6 = vmor %vm167_vm5, %vm168_vm4 }
 0x28c   :  { %v164_v28 = vsub.f32 1.0, %v163_v27 }
 0x28e   :  { %v165_v30 = vmul.f32 %v210_v26, %v164_v28 }
 0x290   :  { %v166_v32 = vadd.f32 %v210_v26, %v165_v30 }
 0x292   :  { %v170_v34 = vsel %vm169_vm6, %v210_v26, %v166_v32 }
 0x293   :  { %v175_v35 = vsel %vm172_vm7, %v174_v33, %v170_v34 }
 0x294   :  { %v176_v36 = vmul.f32 %v175_v35, %v157_v24 }
 0x296   :  { %178 = vrot.lane.b32.xlu2 %v176_v36, %s296_s2 }
 0x2f0   :  { %v179_v37 = vpop.permute.xlu2 %178 }
 0x2f1   :  { %181 = vst.msk [vmem:[%s340_s3] sm:$0xff] %vm61_vm1, %v179_v37 }
 0x2f2   :  { %186 = vsyncpa [#allocation5], 1 }
 0x2f3   :  { %187 = vsyncpa [#allocation7], 1 }

</bundles_post_ra>
